<compile_context>
chip_gen: v7x
topology: tpu7x:2x2x1
jax: 0.10.0
libtpu: 0.0.40
codegen_flags: <defaults>
</compile_context>

<pallas_src>
import functools

import jax
import jax.numpy as jnp
from jax.experimental import pallas as pl
from jax.experimental.pallas import tpu as pltpu

_MiB = 1024 * 1024


def _round_up(v, m):
    return ((v + m - 1) // m) * m


def _vmem_capacity_bytes():
    """Physical VMEM per TensorCore, with conservative fallbacks."""
    try:
        info = pltpu.get_tpu_info()
        cap = getattr(info, "vmem_capacity_bytes", None)
        if cap:
            return int(cap)
    except Exception:
        pass
    try:
        kind = jax.devices()[0].device_kind.lower()
        if "v7" in kind or "7x" in kind:
            return 64 * _MiB          # v7x: 64 MiB per TensorCore
    except Exception:
        pass
    return 128 * _MiB                 # v5e / v6e


def _num_tensorcores_per_chip():
    """One grid split per TensorCore: 1 on v5e/v6e, 2 on v7x-style chips."""
    try:
        kind = jax.devices()[0].device_kind.lower()
        if "v7" in kind or "7x" in kind:
            return 2
    except Exception:
        pass
    return 1


# ----------------------------------------------------------------------------
# Pallas kernel: fused observer statistics
# ----------------------------------------------------------------------------
def _observer_kernel(x_ref, y_ref, act_ref, kvmin_ref, kvmax_ref,
                     *, m_rows, tm):
    i = pl.program_id(0)            # split index (one per TC on 2-TC chips)
    j = pl.program_id(1)            # row-tile index within the split
    nt = pl.num_programs(1)

    @pl.when(j == 0)
    def _init():
        act_ref[...] = jnp.zeros(act_ref.shape, act_ref.dtype)
        kvmin_ref[...] = jnp.full(kvmin_ref.shape, jnp.inf, kvmin_ref.dtype)
        kvmax_ref[...] = jnp.full(kvmax_ref.shape, -jnp.inf, kvmax_ref.dtype)

    # Unclamped logical row offset of this tile.  The input index_map clamps
    # the block index so the DMA always reads real data; redundant blocks and
    # the padded tail of a partial block are neutralized on the masked path.
    row0 = (i * nt + j) * tm
    is_partial = row0 + tm > m_rows

    x = x_ref[...]                  # (tm, H) layer input tile (native dtype)
    y = y_ref[...]                  # (tm, C) layer output tile (native dtype)

    def _accumulate(x_absmax, y_min, y_max):
        # Reduced rows are (1, H)/(1, C); [None] lifts to the (1, 1, *) block.
        act_ref[...] = jnp.maximum(act_ref[...],
                                   x_absmax.astype(jnp.float32)[None])
        kvmin_ref[...] = jnp.minimum(kvmin_ref[...],
                                     y_min.astype(jnp.float32)[None])
        kvmax_ref[...] = jnp.maximum(kvmax_ref[...],
                                     y_max.astype(jnp.float32)[None])

    @pl.when(jnp.logical_not(is_partial))
    def _full_tile():
        # Hot path: no masking, no extra (tm, C) temporaries.
        _accumulate(jnp.max(jnp.abs(x), axis=0, keepdims=True),
                    jnp.min(y, axis=0, keepdims=True),
                    jnp.max(y, axis=0, keepdims=True))

    @pl.when(is_partial)
    def _partial_tile():
        # Tail / redundant tiles only: mask invalid rows to neutral values.
        row_ids = jax.lax.broadcasted_iota(jnp.int32, (tm, 1), 0) + row0
        valid = row_ids < m_rows
        _accumulate(
            jnp.max(jnp.where(valid, jnp.abs(x), 0), axis=0, keepdims=True),
            jnp.min(jnp.where(valid, y, jnp.inf), axis=0, keepdims=True),
            jnp.max(jnp.where(valid, y, -jnp.inf), axis=0, keepdims=True))


@functools.partial(jax.jit,
                   static_argnames=("num_splits", "vmem_budget_bytes",
                                    "vmem_capacity_bytes"))
def _observer_stats(x, y, *, num_splits, vmem_budget_bytes,
                    vmem_capacity_bytes):
    """Fused observer statistics over flattened activations.

    x: layer input,  shape [M, H]
    y: layer output, shape [M, C]
    Returns (act_absmax[1,1], kv_min[1,C], kv_max[1,C], smooth_absmax[1,C]).
    """
    M, H = x.shape
    M2, C = y.shape
    assert M == M2, "input/output must have the same number of rows"

    bx = jnp.dtype(x.dtype).itemsize
    by = jnp.dtype(y.dtype).itemsize
    bytes_per_row = H * bx + C * by
    rows_per_split = pl.cdiv(M, num_splits)

    # Row tile: the largest that fits the double-buffered input budget,
    # capped only by this split's share of the rows (no fixed row cap, so
    # small-channel shapes still get multi-MiB DMAs per grid step).
    tm = max(8, (vmem_budget_bytes // (2 * bytes_per_row)) // 8 * 8)
    tm = min(tm, max(8, (rows_per_split // 8) * 8))
    if tm >= 32:
        tm = (tm // 32) * 32        # bf16 packs 16 rows/vreg, int8/fp8 pack 32

    num_blocks = pl.cdiv(M, tm)               # real row tiles
    nt = pl.cdiv(num_blocks, num_splits)      # row tiles per split
    grid = (num_splits, nt)

    # Explicit VMEM limit sized from the actual working set (double-buffered
    # x and y tiles) with headroom, kept below the physical capacity.
    working_set = 2 * tm * bytes_per_row
    vmem_limit = int(min(vmem_capacity_bytes - 8 * _MiB,
                         working_set * 1.25 + 8 * _MiB))
    vmem_limit = max(vmem_limit, 32 * _MiB)

    def in_map(i, j):
        # Clamp so the DMA never addresses a fully out-of-range block; the
        # redundant blocks re-read the last real tile and are fully masked.
        return (jnp.minimum(i * nt + j, num_blocks - 1), 0)

    out_shapes = (
        jax.ShapeDtypeStruct((num_splits, 1, H), jnp.float32),  # act |x| max
        jax.ShapeDtypeStruct((num_splits, 1, C), jnp.float32),  # kv min
        jax.ShapeDtypeStruct((num_splits, 1, C), jnp.float32),  # kv max
    )

    kernel = functools.partial(_observer_kernel, m_rows=M, tm=tm)

    # On v7x the split axis ("parallel") is intended to shard across the two
    # TensorCores; if profiling shows it does not, switch this axis to
    # pltpu.CORE_PARALLEL.
    act_part, kvmin_part, kvmax_part = pl.pallas_call(
        kernel,
        out_shape=out_shapes,
        grid_spec=pltpu.PrefetchScalarGridSpec(
            num_scalar_prefetch=0,
            grid=grid,
            in_specs=[
                pl.BlockSpec((tm, H), in_map),
                pl.BlockSpec((tm, C), in_map),
            ],
            out_specs=[
                pl.BlockSpec((1, 1, H), lambda i, j: (i, 0, 0)),
                pl.BlockSpec((1, 1, C), lambda i, j: (i, 0, 0)),
                pl.BlockSpec((1, 1, C), lambda i, j: (i, 0, 0)),
            ],
        ),
        compiler_params=pltpu.CompilerParams(
            dimension_semantics=("parallel", "arbitrary"),
            vmem_limit_bytes=vmem_limit),
    )(x, y)

    # Tiny O(channels) combine of the per-split partials in plain JAX.
    # NOTE: combine min/max across splits BEFORE taking abs so an all-masked
    # split's +/-inf partials cannot leak into smooth_absmax.
    act_absmax = jnp.max(act_part).reshape(1, 1)
    kv_min = jnp.min(kvmin_part, axis=0)                  # (1, C)
    kv_max = jnp.max(kvmax_part, axis=0)                  # (1, C)
    smooth_absmax = jnp.maximum(jnp.abs(kv_min), jnp.abs(kv_max))
    return act_absmax, kv_min, kv_max, smooth_absmax


def ptq_observer_forward(x, y, num_splits=None, vmem_budget_bytes=None):
    """Generation-aware wrapper around the fused statistics kernel."""
    if num_splits is None:
        num_splits = _num_tensorcores_per_chip()
    cap = _vmem_capacity_bytes()
    if vmem_budget_bytes is None:
        # 64 MiB-per-TC chips (v7x) get a 24 MiB double-buffer budget;
        # 128 MiB chips (v5e/v6e) get 48 MiB so tm isn't budget-limited.
        vmem_budget_bytes = 24 * _MiB if cap <= 64 * _MiB else 48 * _MiB
    return _observer_stats(x, y, num_splits=num_splits,
                           vmem_budget_bytes=vmem_budget_bytes,
                           vmem_capacity_bytes=cap)


# ----------------------------------------------------------------------------
# PTQObserver wrapper (glue in plain JAX)
# ----------------------------------------------------------------------------
class PTQObserverPallas:
    """JAX/Pallas equivalent of PTQObserver for a Linear layer.

    Sub-observers are realized by the fused statistics kernel above; the
    derived quantization scales are computed from those statistics in plain
    JAX (cheap O(channels) math).
    """

    def __init__(self, weight, quant_algo_dict,
                 act_observer=True, smooth_act_observer=True,
                 kv_cache_observer=True, weight_observer=True):
        self.weight = weight                       # [out_features, in_features]
        self.quant_algo_dict = quant_algo_dict
        self.has_act = act_observer
        self.has_smooth = smooth_act_observer
        self.has_kv = kv_cache_observer
        # weight_observer is configured in __init__ but never invoked by
        # PTQObserver.forward, so no kernel is run for it here.
        # TODO(synk): weight_observer calibration path (not part of forward()).
        self.has_weight = weight_observer
        self.stats = {}

    def __call__(self, x, y):
        """x: layer input [B, S, H]; y: layer output [B, S, C]."""
        B, S, H = x.shape
        C = y.shape[-1]
        x2d = x.reshape(B * S, H)
        y2d = y.reshape(B * S, C)

        act_absmax, kv_min, kv_max, smooth_absmax = ptq_observer_forward(
            x2d, y2d)

        a_bits = self.quant_algo_dict["a_quant_bits"]
        c_bits = self.quant_algo_dict["c_quant_bits"]

        if self.has_act:
            qmax_a = 2.0 ** (a_bits - 1) - 1.0
            self.stats["act_absmax"] = act_absmax
            self.stats["act_scale"] = act_absmax / qmax_a
        if self.has_kv:
            qmax_c = 2.0 ** (c_bits - 1) - 1.0
            kv_absmax = jnp.maximum(jnp.abs(kv_min), jnp.abs(kv_max))
            self.stats["kv_min"] = kv_min
            self.stats["kv_max"] = kv_max
            self.stats["kv_scale"] = kv_absmax / qmax_c
        if self.has_smooth:
            self.stats["smooth_absmax"] = smooth_absmax
        return self.stats


# ----------------------------------------------------------------------------
# main
# ----------------------------------------------------------------------------
if __name__ == "__main__":
    key = jax.random.PRNGKey(0)
    k_x, k_w, k_x2 = jax.random.split(key, 3)

    batch, seq, hidden = 2, 8, 32
    out_features = 32

    # Deterministic "layer" parameters and input.
    x = jax.random.normal(k_x, (batch, seq, hidden), dtype=jnp.float32)
    w = (jax.random.normal(k_w, (out_features, hidden), dtype=jnp.float32)
         * (1.0 / jnp.sqrt(hidden)))
    # Layer output that the observers see (Linear forward: [B, S, C]).
    y = jnp.einsum("bsh,ch->bsc", x, w)

    quant_algo_dict = {
        "a_quant_bits": 8,
        "w_quant_bits": 8,
        "c_quant_bits": 8,
        "c_quant_algo": "per_channel",
        "w_group_size": -1,
    }

    observer = PTQObserverPallas(w, quant_algo_dict)
    stats = observer(x, y)
    jax.block_until_ready(stats)

    # Cross-check against plain-JAX reference (exercises the unmasked path).
    x2d = x.reshape(-1, hidden)
    y2d = y.reshape(-1, out_features)
    ref_act = jnp.max(jnp.abs(x2d)).reshape(1, 1)
    ref_kvmin = jnp.min(y2d, axis=0, keepdims=True)
    ref_kvmax = jnp.max(y2d, axis=0, keepdims=True)
    ref_smooth = jnp.max(jnp.abs(y2d), axis=0, keepdims=True)
    assert jnp.allclose(stats["act_absmax"], ref_act, atol=1e-6)
    assert jnp.allclose(stats["kv_min"], ref_kvmin, atol=1e-6)
    assert jnp.allclose(stats["kv_max"], ref_kvmax, atol=1e-6)
    assert jnp.allclose(stats["smooth_absmax"], ref_smooth, atol=1e-6)

    # Second case with a ragged row count (exercises the masked tail path).
    seq2 = 5
    x2 = jax.random.normal(k_x2, (batch, seq2, hidden), dtype=jnp.float32)
    y2 = jnp.einsum("bsh,ch->bsc", x2, w)
    x2d2 = x2.reshape(-1, hidden)
    y2d2 = y2.reshape(-1, out_features)
    a2, mn2, mx2, sm2 = ptq_observer_forward(x2d2, y2d2)
    jax.block_until_ready((a2, mn2, mx2, sm2))
    assert jnp.allclose(a2, jnp.max(jnp.abs(x2d2)).reshape(1, 1), atol=1e-6)
    assert jnp.allclose(mn2, jnp.min(y2d2, axis=0, keepdims=True), atol=1e-6)
    assert jnp.allclose(mx2, jnp.max(y2d2, axis=0, keepdims=True), atol=1e-6)
    assert jnp.allclose(sm2, jnp.max(jnp.abs(y2d2), axis=0, keepdims=True),
                        atol=1e-6)

    print("KERNEL_OK")
</pallas_src>

<mosaic_0001>
module attributes {stable_mosaic.version = 11 : i64} {
  func.func @_observer_kernel(%arg0: i32, %arg1: i32, %arg2: memref<16x32xf32, #tpu.memory_space<vmem>>, %arg3: memref<16x32xf32, #tpu.memory_space<vmem>>, %arg4: memref<1x1x32xf32, #tpu.memory_space<vmem>>, %arg5: memref<1x1x32xf32, #tpu.memory_space<vmem>>, %arg6: memref<1x1x32xf32, #tpu.memory_space<vmem>>) attributes {dimension_semantics = [#tpu.dimension_semantics<parallel>, #tpu.dimension_semantics<arbitrary>], iteration_bounds = array<i64: 1, 1>, scalar_prefetch = 0 : i64, scratch_operands = 0 : i64, tpu.core_type = #tpu.core_type<tc>, window_params = [{transform_indices = @transform_0, window_bounds = array<i64: 16, 32>}, {transform_indices = @transform_1, window_bounds = array<i64: 16, 32>}, {transform_indices = @transform_2, window_bounds = array<i64: 1, 1, 32>}, {transform_indices = @transform_3, window_bounds = array<i64: 1, 1, 32>}, {transform_indices = @transform_4, window_bounds = array<i64: 1, 1, 32>}]} {
    %c0_i32 = arith.constant 0 : i32
    %0 = arith.cmpi eq, %arg1, %c0_i32 : i32
    %1 = arith.extui %0 : i1 to i32
    %c0_i32_0 = arith.constant 0 : i32
    %2 = arith.cmpi ne, %1, %c0_i32_0 : i32
    scf.if %2 {
      %cst = arith.constant 0.000000e+00 : f32
      %15 = vector.broadcast %cst : f32 to vector<1x1x32xf32>
      %c0_8 = arith.constant 0 : index
      %c0_9 = arith.constant 0 : index
      %c0_10 = arith.constant 0 : index
      %16 = vector.load %arg4[%c0_8, %c0_9, %c0_10] : memref<1x1x32xf32, #tpu.memory_space<vmem>>, vector<1x1x32xf32>
      tpu.vector_store %arg4[%c0_8, %c0_9, %c0_10], %15 {strides = array<i32>} : memref<1x1x32xf32, #tpu.memory_space<vmem>>, vector<1x1x32xf32>,
      %cst_11 = arith.constant 0x7F800000 : f32
      %17 = vector.broadcast %cst_11 : f32 to vector<1x1x32xf32>
      %c0_12 = arith.constant 0 : index
      %c0_13 = arith.constant 0 : index
      %c0_14 = arith.constant 0 : index
      %18 = vector.load %arg5[%c0_12, %c0_13, %c0_14] : memref<1x1x32xf32, #tpu.memory_space<vmem>>, vector<1x1x32xf32>
      tpu.vector_store %arg5[%c0_12, %c0_13, %c0_14], %17 {strides = array<i32>} : memref<1x1x32xf32, #tpu.memory_space<vmem>>, vector<1x1x32xf32>,
      %cst_15 = arith.constant 0xFF800000 : f32
      %19 = vector.broadcast %cst_15 : f32 to vector<1x1x32xf32>
      %c0_16 = arith.constant 0 : index
      %c0_17 = arith.constant 0 : index
      %c0_18 = arith.constant 0 : index
      %20 = vector.load %arg6[%c0_16, %c0_17, %c0_18] : memref<1x1x32xf32, #tpu.memory_space<vmem>>, vector<1x1x32xf32>
      tpu.vector_store %arg6[%c0_16, %c0_17, %c0_18], %19 {strides = array<i32>} : memref<1x1x32xf32, #tpu.memory_space<vmem>>, vector<1x1x32xf32>,
    } else {
    }
    %c1_i32 = arith.constant 1 : i32
    %3 = arith.muli %arg0, %c1_i32 : i32
    %4 = arith.addi %3, %arg1 : i32
    %c16_i32 = arith.constant 16 : i32
    %5 = arith.muli %4, %c16_i32 : i32
    %c16_i32_1 = arith.constant 16 : i32
    %6 = arith.addi %5, %c16_i32_1 : i32
    %c16_i32_2 = arith.constant 16 : i32
    %7 = arith.cmpi sgt, %6, %c16_i32_2 : i32
    %c0 = arith.constant 0 : index
    %c0_3 = arith.constant 0 : index
    %8 = vector.load %arg2[%c0, %c0_3] : memref<16x32xf32, #tpu.memory_space<vmem>>, vector<16x32xf32>
    %c0_4 = arith.constant 0 : index
    %c0_5 = arith.constant 0 : index
    %9 = vector.load %arg3[%c0_4, %c0_5] : memref<16x32xf32, #tpu.memory_space<vmem>>, vector<16x32xf32>
    %true = arith.constant true
    %10 = arith.xori %7, %true : i1
    %11 = arith.extui %10 : i1 to i32
    %c0_i32_6 = arith.constant 0 : i32
    %12 = arith.cmpi ne, %11, %c0_i32_6 : i32
    scf.if %12 {
      %15 = math.absf %8 : vector<16x32xf32>
      %cst = arith.constant dense<0xFF800000> : vector<32xf32>
      %16 = vector.multi_reduction <maximumf>, %15, %cst [0] : vector<16x32xf32> to vector<32xf32>
      %17 = vector.shape_cast %16 : vector<32xf32> to vector<1x32xf32>
      %cst_8 = arith.constant dense<0x7F800000> : vector<32xf32>
      %18 = vector.multi_reduction <minimumf>, %9, %cst_8 [0] : vector<16x32xf32> to vector<32xf32>
      %19 = vector.shape_cast %18 : vector<32xf32> to vector<1x32xf32>
      %cst_9 = arith.constant dense<0xFF800000> : vector<32xf32>
      %20 = vector.multi_reduction <maximumf>, %9, %cst_9 [0] : vector<16x32xf32> to vector<32xf32>
      %21 = vector.shape_cast %20 : vector<32xf32> to vector<1x32xf32>
      %c0_10 = arith.constant 0 : index
      %c0_11 = arith.constant 0 : index
      %c0_12 = arith.constant 0 : index
      %22 = vector.load %arg4[%c0_10, %c0_11, %c0_12] : memref<1x1x32xf32, #tpu.memory_space<vmem>>, vector<1x1x32xf32>
      %23 = vector.shape_cast %17 : vector<1x32xf32> to vector<1x1x32xf32>
      %24 = arith.maximumf %22, %23 : vector<1x1x32xf32>
      %c0_13 = arith.constant 0 : index
      %c0_14 = arith.constant 0 : index
      %c0_15 = arith.constant 0 : index
      %25 = vector.load %arg4[%c0_13, %c0_14, %c0_15] : memref<1x1x32xf32, #tpu.memory_space<vmem>>, vector<1x1x32xf32>
      tpu.vector_store %arg4[%c0_13, %c0_14, %c0_15], %24 {strides = array<i32>} : memref<1x1x32xf32, #tpu.memory_space<vmem>>, vector<1x1x32xf32>,
      %c0_16 = arith.constant 0 : index
      %c0_17 = arith.constant 0 : index
      %c0_18 = arith.constant 0 : index
      %26 = vector.load %arg5[%c0_16, %c0_17, %c0_18] : memref<1x1x32xf32, #tpu.memory_space<vmem>>, vector<1x1x32xf32>
      %27 = vector.shape_cast %19 : vector<1x32xf32> to vector<1x1x32xf32>
      %28 = arith.minimumf %26, %27 : vector<1x1x32xf32>
      %c0_19 = arith.constant 0 : index
      %c0_20 = arith.constant 0 : index
      %c0_21 = arith.constant 0 : index
      %29 = vector.load %arg5[%c0_19, %c0_20, %c0_21] : memref<1x1x32xf32, #tpu.memory_space<vmem>>, vector<1x1x32xf32>
      tpu.vector_store %arg5[%c0_19, %c0_20, %c0_21], %28 {strides = array<i32>} : memref<1x1x32xf32, #tpu.memory_space<vmem>>, vector<1x1x32xf32>,
      %c0_22 = arith.constant 0 : index
      %c0_23 = arith.constant 0 : index
      %c0_24 = arith.constant 0 : index
      %30 = vector.load %arg6[%c0_22, %c0_23, %c0_24] : memref<1x1x32xf32, #tpu.memory_space<vmem>>, vector<1x1x32xf32>
      %31 = vector.shape_cast %21 : vector<1x32xf32> to vector<1x1x32xf32>
      %32 = arith.maximumf %30, %31 : vector<1x1x32xf32>
      %c0_25 = arith.constant 0 : index
      %c0_26 = arith.constant 0 : index
      %c0_27 = arith.constant 0 : index
      %33 = vector.load %arg6[%c0_25, %c0_26, %c0_27] : memref<1x1x32xf32, #tpu.memory_space<vmem>>, vector<1x1x32xf32>
      tpu.vector_store %arg6[%c0_25, %c0_26, %c0_27], %32 {strides = array<i32>} : memref<1x1x32xf32, #tpu.memory_space<vmem>>, vector<1x1x32xf32>,
    } else {
    }
    %13 = arith.extui %7 : i1 to i32
    %c0_i32_7 = arith.constant 0 : i32
    %14 = arith.cmpi ne, %13, %c0_i32_7 : i32
    scf.if %14 {
      %15 = tpu.iota {dimensions = array<i32: 0>} : vector<16x1xi32>
      %16 = vector.broadcast %5 : i32 to vector<16x1xi32>
      %17 = arith.addi %15, %16 : vector<16x1xi32>
      %c16_i32_8 = arith.constant 16 : i32
      %18 = vector.broadcast %c16_i32_8 : i32 to vector<16x1xi32>
      %19 = arith.cmpi slt, %17, %18 : vector<16x1xi32>
      %20 = math.absf %8 : vector<16x32xf32>
      %c0_i32_9 = arith.constant 0 : i32
      %21 = arith.sitofp %c0_i32_9 : i32 to f32
      %22 = vector.shape_cast %19 : vector<16x1xi1> to vector<16x1xi1>
      %23 = vector.broadcast %22 : vector<16x1xi1> to vector<16x32xi1>
      %24 = vector.broadcast %21 : f32 to vector<16x32xf32>
      %25 = arith.select %23, %20, %24 : vector<16x32xi1>, vector<16x32xf32>
      %cst = arith.constant dense<0xFF800000> : vector<32xf32>
      %26 = vector.multi_reduction <maximumf>, %25, %cst [0] : vector<16x32xf32> to vector<32xf32>
      %27 = vector.shape_cast %26 : vector<32xf32> to vector<1x32xf32>
      %cst_10 = arith.constant 0x7F800000 : f32
      %28 = vector.shape_cast %19 : vector<16x1xi1> to vector<16x1xi1>
      %29 = vector.broadcast %28 : vector<16x1xi1> to vector<16x32xi1>
      %30 = vector.broadcast %cst_10 : f32 to vector<16x32xf32>
      %31 = arith.select %29, %9, %30 : vector<16x32xi1>, vector<16x32xf32>
      %cst_11 = arith.constant dense<0x7F800000> : vector<32xf32>
      %32 = vector.multi_reduction <minimumf>, %31, %cst_11 [0] : vector<16x32xf32> to vector<32xf32>
      %33 = vector.shape_cast %32 : vector<32xf32> to vector<1x32xf32>
      %cst_12 = arith.constant 0xFF800000 : f32
      %34 = vector.shape_cast %19 : vector<16x1xi1> to vector<16x1xi1>
      %35 = vector.broadcast %34 : vector<16x1xi1> to vector<16x32xi1>
      %36 = vector.broadcast %cst_12 : f32 to vector<16x32xf32>
      %37 = arith.select %35, %9, %36 : vector<16x32xi1>, vector<16x32xf32>
      %cst_13 = arith.constant dense<0xFF800000> : vector<32xf32>
      %38 = vector.multi_reduction <maximumf>, %37, %cst_13 [0] : vector<16x32xf32> to vector<32xf32>
      %39 = vector.shape_cast %38 : vector<32xf32> to vector<1x32xf32>
      %c0_14 = arith.constant 0 : index
      %c0_15 = arith.constant 0 : index
      %c0_16 = arith.constant 0 : index
      %40 = vector.load %arg4[%c0_14, %c0_15, %c0_16] : memref<1x1x32xf32, #tpu.memory_space<vmem>>, vector<1x1x32xf32>
      %41 = vector.shape_cast %27 : vector<1x32xf32> to vector<1x1x32xf32>
      %42 = arith.maximumf %40, %41 : vector<1x1x32xf32>
      %c0_17 = arith.constant 0 : index
      %c0_18 = arith.constant 0 : index
      %c0_19 = arith.constant 0 : index
      %43 = vector.load %arg4[%c0_17, %c0_18, %c0_19] : memref<1x1x32xf32, #tpu.memory_space<vmem>>, vector<1x1x32xf32>
      tpu.vector_store %arg4[%c0_17, %c0_18, %c0_19], %42 {strides = array<i32>} : memref<1x1x32xf32, #tpu.memory_space<vmem>>, vector<1x1x32xf32>,
      %c0_20 = arith.constant 0 : index
      %c0_21 = arith.constant 0 : index
      %c0_22 = arith.constant 0 : index
      %44 = vector.load %arg5[%c0_20, %c0_21, %c0_22] : memref<1x1x32xf32, #tpu.memory_space<vmem>>, vector<1x1x32xf32>
      %45 = vector.shape_cast %33 : vector<1x32xf32> to vector<1x1x32xf32>
      %46 = arith.minimumf %44, %45 : vector<1x1x32xf32>
      %c0_23 = arith.constant 0 : index
      %c0_24 = arith.constant 0 : index
      %c0_25 = arith.constant 0 : index
      %47 = vector.load %arg5[%c0_23, %c0_24, %c0_25] : memref<1x1x32xf32, #tpu.memory_space<vmem>>, vector<1x1x32xf32>
      tpu.vector_store %arg5[%c0_23, %c0_24, %c0_25], %46 {strides = array<i32>} : memref<1x1x32xf32, #tpu.memory_space<vmem>>, vector<1x1x32xf32>,
      %c0_26 = arith.constant 0 : index
      %c0_27 = arith.constant 0 : index
      %c0_28 = arith.constant 0 : index
      %48 = vector.load %arg6[%c0_26, %c0_27, %c0_28] : memref<1x1x32xf32, #tpu.memory_space<vmem>>, vector<1x1x32xf32>
      %49 = vector.shape_cast %39 : vector<1x32xf32> to vector<1x1x32xf32>
      %50 = arith.maximumf %48, %49 : vector<1x1x32xf32>
      %c0_29 = arith.constant 0 : index
      %c0_30 = arith.constant 0 : index
      %c0_31 = arith.constant 0 : index
      %51 = vector.load %arg6[%c0_29, %c0_30, %c0_31] : memref<1x1x32xf32, #tpu.memory_space<vmem>>, vector<1x1x32xf32>
      tpu.vector_store %arg6[%c0_29, %c0_30, %c0_31], %50 {strides = array<i32>} : memref<1x1x32xf32, #tpu.memory_space<vmem>>, vector<1x1x32xf32>,
    } else {
    }
    return
  }
  func.func @transform_0(%arg0: i32, %arg1: i32) -> (i32, i32) {
    %c1_i32 = arith.constant 1 : i32
    %0 = arith.muli %arg0, %c1_i32 : i32
    %1 = arith.addi %0, %arg1 : i32
    %c0_i32 = arith.constant 0 : i32
    %2 = arith.minsi %1, %c0_i32 : i32
    %c0_i32_0 = arith.constant 0 : i32
    %c0_i32_1 = arith.constant 0 : i32
    return %2, %c0_i32_0 : i32, i32
  }
  func.func @transform_1(%arg0: i32, %arg1: i32) -> (i32, i32) {
    %c1_i32 = arith.constant 1 : i32
    %0 = arith.muli %arg0, %c1_i32 : i32
    %1 = arith.addi %0, %arg1 : i32
    %c0_i32 = arith.constant 0 : i32
    %2 = arith.minsi %1, %c0_i32 : i32
    %c0_i32_0 = arith.constant 0 : i32
    %c0_i32_1 = arith.constant 0 : i32
    return %2, %c0_i32_0 : i32, i32
  }
  func.func @transform_2(%arg0: i32, %arg1: i32) -> (i32, i32, i32) {
    %c0_i32 = arith.constant 0 : i32
    %c0_i32_0 = arith.constant 0 : i32
    %c0_i32_1 = arith.constant 0 : i32
    return %arg0, %c0_i32, %c0_i32_0 : i32, i32, i32
  }
  func.func @transform_3(%arg0: i32, %arg1: i32) -> (i32, i32, i32) {
    %c0_i32 = arith.constant 0 : i32
    %c0_i32_0 = arith.constant 0 : i32
    %c0_i32_1 = arith.constant 0 : i32
    return %arg0, %c0_i32, %c0_i32_0 : i32, i32, i32
  }
  func.func @transform_4(%arg0: i32, %arg1: i32) -> (i32, i32, i32) {
    %c0_i32 = arith.constant 0 : i32
    %c0_i32_0 = arith.constant 0 : i32
    %c0_i32_1 = arith.constant 0 : i32
    return %arg0, %c0_i32, %c0_i32_0 : i32, i32, i32
  }
}

</mosaic_0001>

<bundles_post_ra>
// kernel: _observer_stats.1
= control target key start
LH: loop header
LB: loop body
LE: loop exit
PB: predicated region body
PF: predicated region fallthrough
CT: control target
= control target key end

     0   :  { %10 = vsyncpa [#allocation3], 0  ;;  %s345_s0 = inlined_call_operand.hbm [shape: f32[16,32], index: 0, kind: input, shape index: {}]   ;;  %s346_s1 = inlined_call_operand.hbm [shape: f32[16,32], index: 1, kind: input, shape index: {}]   ;;  %s347_s2 = inlined_call_operand.vmem [shape: f32[1,1,32], index: 2, kind: output, shape index: {0}]   ;;  %s348_s3 = inlined_call_operand.vmem [shape: f32[1,1,32], index: 3, kind: output, shape index: {1}]   ;;  %s349_s4 = inlined_call_operand.vmem [shape: f32[1,1,32], index: 4, kind: output, shape index: {2}]  }
   0x1   :  { %11 = vsyncpa [#allocation5], 0  ;;  %s256_s15 = smov [#allocation2]   ;;  %s208_s19 = scalar_lea.hbm %s345_s0, 256 }
   0x2   :  { %s23_s16 = sshll.u32 %s256_s15, 4  ;;  %p209_p0 = scmp.ne.s32.totalorder %s345_s0, %s208_s19  ;;  %s24_s16 = int_to_ptr.vmem [resolvable:$true] %s23_s16 }
   0x3   :  { %p212_p1 = scmp.lt.u32.totalorder %s208_s19, %s345_s0 }
   0x5   :  { %p214_p2 = pnand %p212_p1, %p209_p0 }
   0x7   :  { %217 = shalt.err (!%p214_p2)
}
   0x8   :  { %s218_s24 = scalar_lea.vmem %s24_s16, 256  ;;  %p223_p4 = scmp.lt.s32.totalorder %s24_s16, %s24_s16 }
   0x9   :  { %p219_p3 = scmp.ne.s32.totalorder %s24_s16, %s218_s24  ;;  %p224_p5 = scmp.lt.s32.totalorder %s218_s24, %s218_s24 }
   0xb   :  { %p225_p6 = por %p224_p5, %p223_p4 }
   0xd   :  { %p226_p7 = pnand %p225_p6, %p219_p3 }
   0xf   :  { %229 = shalt.err (!%p226_p7)
}
  0x10   :  { %s257_s25 = smov 128   ;;  %s258_s26 = smov 8  }
  0x11   :  { %29 = dma.hbm_to_vmem [thread:$0]  %s345_s0, 256, %s24_s16, [#allocation3], %s257_s25, %s257_s25, %s258_s26  }
  0x12   :  { %s259_s29 = smov [#allocation4]   ;;  %s230_s7 = scalar_lea.hbm %s346_s1, 256 }
  0x13   :  { %s41_s30 = sshll.u32 %s259_s29, 4  ;;  %p231_p8 = scmp.ne.s32.totalorder %s346_s1, %s230_s7  ;;  %s42_s30 = int_to_ptr.vmem [resolvable:$true] %s41_s30 }
  0x14   :  { %p234_p9 = scmp.lt.u32.totalorder %s230_s7, %s346_s1 }
  0x16   :  { %p236_p10 = pnand %p234_p9, %p231_p8 }
  0x18   :  { %239 = shalt.err (!%p236_p10)
}
  0x19   :  { %s240_s12 = scalar_lea.vmem %s42_s30, 256  ;;  %p245_p12 = scmp.lt.s32.totalorder %s42_s30, %s42_s30 }
  0x1a   :  { %p241_p11 = scmp.ne.s32.totalorder %s42_s30, %s240_s12  ;;  %p246_p13 = scmp.lt.s32.totalorder %s240_s12, %s240_s12 }
  0x1c   :  { %p247_p0 = por %p246_p13, %p245_p12 }
  0x1e   :  { %p248_p1 = pnand %p247_p0, %p241_p11 }
  0x20   :  { %251 = shalt.err (!%p248_p1)
}
  0x21   :  { %47 = dma.hbm_to_vmem [thread:$0]  %s346_s1, 256, %s42_s30, [#allocation5], %s257_s25, %s257_s25, %s258_s26  }
  0x22   :  { %252 = dma.done.wait [#allocation3], 256  }
  0x23   :  { %253 = vsyncadd [#allocation3], 4294967040 }
  0x24   :  { %254 = dma.done.wait [#allocation5], 256  }
  0x25   :  { %255 = vsyncadd [#allocation5], 4294967040  ;;  %vm66_vm0 = vcmask 253952   ;;  %v260_v0 = vmov 0.0   ;;  %v261_v1 = vmov inf   ;;  %v262_v2 = vmov -inf  }
  0x26   :  { %67 = vst.msk [vmem:[%s347_s2] sm:$0x1] %vm66_vm0, %v260_v0  ;;  %68 = vst.msk [vmem:[%s348_s3] sm:$0x1] %vm66_vm0, %v261_v1  ;;  %vm84_vm1 = vcmask 261120   ;;  %v74_v3 = vld [vmem:[#allocation2] sm:$0xff] }
  0x27   :  { %69 = vst.msk [vmem:[%s349_s4] sm:$0x1] %vm66_vm0, %v262_v2  ;;  %v75_v4 = vld [vmem:[#allocation2 + $0x8] sm:$0xff]  ;;  %v76_v5 = vld [vmem:[#allocation4] sm:$0xff]  ;;  %v82_v6 = vand.u32 2147483647, %v74_v3 }
  0x28   :  { %v83_v7 = vand.u32 2147483647, %v75_v4  ;;  %v77_v8 = vld [vmem:[#allocation4 + $0x8] sm:$0xff]  ;;  %v94_v9 = vsel %vm84_vm1, %v76_v5, inf  ;;  %v103_v10 = vsel %vm84_vm1, %v76_v5, -inf }
  0x29   :  { %v85_v11 = vsel %vm84_vm1, %v82_v6, -inf  ;;  %v95_v13 = vsel %vm84_vm1, %v77_v8, inf  ;;  %v104_v14 = vsel %vm84_vm1, %v77_v8, -inf }
  0x2a   :  { %v86_v12 = vsel %vm84_vm1, %v83_v7, -inf  ;;  %v96_v16 = vmin.f32 %v94_v9, %v95_v13  ;;  %v105_v17 = vmax.f32 %v103_v10, %v104_v14 }
  0x2b   :  { %v87_v15 = vmax.f32 %v85_v11, %v86_v12 }
  0x2c   :  { %v97_v19 = vrot.slane %v96_v16, 4  ;;  %v106_v20 = vrot.slane %v105_v17, 4 }
  0x2d   :  { %v88_v18 = vrot.slane %v87_v15, 4  ;;  %v112_v33 = vld [vmem:[%s347_s2] sm:$0x1] }
  0x2e   :  { %v98_v22 = vmin.f32 %v96_v16, %v97_v19  ;;  %v107_v23 = vmax.f32 %v105_v17, %v106_v20  ;;  %v116_v34 = vld [vmem:[%s348_s3] sm:$0x1] }
  0x2f   :  { %v89_v21 = vmax.f32 %v87_v15, %v88_v18  ;;  %v119_v35 = vld [vmem:[%s349_s4] sm:$0x1] }
  0x30   :  { %v99_v25 = vrot.slane %v98_v22, 2  ;;  %v108_v26 = vrot.slane %v107_v23, 2 }
  0x31   :  { %v90_v24 = vrot.slane %v89_v21, 2 }
  0x32   :  { %v100_v28 = vmin.f32 %v98_v22, %v99_v25  ;;  %v109_v29 = vmax.f32 %v107_v23, %v108_v26 }
  0x33   :  { %v91_v27 = vmax.f32 %v89_v21, %v90_v24 }
  0x34   :  { %v101_v31 = vrot.slane %v100_v28, 1  ;;  %v110_v32 = vrot.slane %v109_v29, 1 }
  0x35   :  { %v92_v30 = vrot.slane %v91_v27, 1 }
  0x36   :  { %v102_v37 = vmin.f32 %v100_v28, %v101_v31  ;;  %v111_v38 = vmax.f32 %v109_v29, %v110_v32 }
  0x37   :  { %v93_v36 = vmax.f32 %v91_v27, %v92_v30 }
  0x38   :  { %v117_v40 = vmin.f32 %v116_v34, %v102_v37  ;;  %v120_v41 = vmax.f32 %v119_v35, %v111_v38 }
  0x39   :  { %v113_v39 = vmax.f32 %v112_v33, %v93_v36 }
  0x3a   :  { %118 = vst.msk [vmem:[%s348_s3] sm:$0x1] %vm66_vm0, %v117_v40  ;;  %121 = vst.msk [vmem:[%s349_s4] sm:$0x1] %vm66_vm0, %v120_v41 }
  0x3b   :  { %115 = vst.msk [vmem:[%s347_s2] sm:$0x1] %vm66_vm0, %v113_v39 }
  0x3c   :  { %195 = vsyncpa [#allocation3], 1 }
  0x3d   :  { %196 = vsyncpa [#allocation5], 1 }

</bundles_post_ra>
